<compile_context>
chip_gen: v5e
topology: v5e:2x2
jax: 0.10.0
libtpu: 0.0.40
codegen_flags: <defaults>
</compile_context>

<pallas_src>
import jax
import jax.numpy as jnp
from jax import lax
from jax.experimental import pallas as pl
from jax.experimental.pallas import tpu as pltpu


def _gcn_kernel(adj_ref, x_ref, w_ref, b_ref, out_ref):
    # adj_ref: (TB, N, N)    x_ref: (TB, N, D_in)
    # w_ref:   (D_in, Dp)    b_ref: (1, Dp)
    # out_ref: (TB, N, Dp)
    adj = adj_ref[...]
    x = x_ref[...]

    # ah = adjacency @ node_features, batched over TB; contraction over the
    # shared node axis expressed directly (no materialized transpose).
    ah = lax.dot_general(
        adj, x,
        dimension_numbers=(((2,), (1,)), ((0,), (0,))),
        preferred_element_type=jnp.float32)                    # (TB, N, D_in)

    tb, n, d_in = ah.shape
    # Flatten batch/node dims so the Linear layer is one MXU-sized GEMM.
    ah2 = ah.reshape(tb * n, d_in)                             # (TB*N, D_in)
    out = jnp.dot(ah2, w_ref[...],
                  preferred_element_type=jnp.float32)          # (TB*N, Dp)
    out = out + b_ref[...]                                     # bias broadcast
    out_ref[...] = out.reshape(tb, n, -1).astype(out_ref.dtype)


def _pick_batch_tile(B, N, D_in, Dp, target_rows=512, vmem_budget_bytes=12 << 20):
    """Largest divisor TB of B whose double-buffered fp32 working set stays well
    under the default scoped-VMEM budget; stop once TB*N reaches target_rows
    (fills the 256-wide MXU on v6e/v7x, 128-wide on v5e)."""
    best = 1
    for tb in range(1, B + 1):
        if B % tb:
            continue
        per_step = 4 * tb * N * (N + D_in + Dp)   # adj + x + out blocks (fp32)
        if 2 * per_step > vmem_budget_bytes:      # pipeline double-buffers blocks
            break
        best = tb
        if tb * N >= target_rows:
            break
    return best


def gcn_net_forward(node_features, adjacency, weight, bias):
    """node_features [B,N,D_in], adjacency [B,N,N], weight [D_in,D_out], bias [D_out]
    -> [B, N, D_out].  Eval-mode forward of GcnNet (dropout = identity)."""
    # TODO(synk): training-mode dropout omitted; eval/inference semantics only.
    B, N, D_in = node_features.shape
    assert adjacency.shape == (B, N, N)
    D_out = weight.shape[1]

    # Lane-dense output: pad the output feature dim up to a multiple of 128 so
    # stores are unmasked full-lane writes; extra (zero) columns sliced off.
    Dp = ((D_out + 127) // 128) * 128
    if Dp != D_out:
        weight = jnp.pad(weight, ((0, 0), (0, Dp - D_out)))
        bias = jnp.pad(bias, (0, Dp - D_out))
    bias2 = bias.reshape(1, Dp).astype(jnp.float32)

    TB = _pick_batch_tile(B, N, D_in, Dp)
    grid = (B // TB,)

    out = pl.pallas_call(
        _gcn_kernel,
        out_shape=jax.ShapeDtypeStruct((B, N, Dp), jnp.float32),
        grid_spec=pltpu.PrefetchScalarGridSpec(
            num_scalar_prefetch=0,
            grid=grid,
            in_specs=[
                pl.BlockSpec((TB, N, N), lambda b: (b, 0, 0)),      # adjacency
                pl.BlockSpec((TB, N, D_in), lambda b: (b, 0, 0)),   # features
                pl.BlockSpec((D_in, Dp), lambda b: (0, 0)),         # weight (resident)
                pl.BlockSpec((1, Dp), lambda b: (0, 0)),            # bias  (resident)
            ],
            out_specs=pl.BlockSpec((TB, N, Dp), lambda b: (b, 0, 0)),
        ),
        compiler_params=pltpu.CompilerParams(
            dimension_semantics=("parallel",)),
    )(adjacency, node_features, weight.astype(jnp.float32), bias2)

    return out[:, :, :D_out] if Dp != D_out else out


def _reference(node_features, adjacency, weight, bias):
    ah = jnp.einsum("bnm,bmd->bnd", adjacency, node_features)
    return ah @ weight + bias


if __name__ == "__main__":
    # Small shapes consistent with GcnNet.forward:
    #   node_features: [B, N, input_dim], adjacency: [B, N, N]
    B, N = 2, 8
    input_dim, output_dim = 32, 16
    dropout_rate = 0.1  # identity in eval mode

    key = jax.random.PRNGKey(0)
    kx, ka, kw, kb = jax.random.split(key, 4)

    node_features = jax.random.normal(kx, (B, N, input_dim), dtype=jnp.float32)
    # Row-normalized random adjacency with self-loops (typical GCN input).
    adj_raw = jax.random.uniform(ka, (B, N, N), dtype=jnp.float32) + jnp.eye(N, dtype=jnp.float32)
    adjacency = adj_raw / jnp.sum(adj_raw, axis=-1, keepdims=True)

    # nn.Linear-style init; weight is (out, in) in torch -> generate (in, out) here.
    bound = 1.0 / (input_dim ** 0.5)
    weight = jax.random.uniform(kw, (input_dim, output_dim),
                                minval=-bound, maxval=bound, dtype=jnp.float32)
    bias = jax.random.uniform(kb, (output_dim,),
                              minval=-bound, maxval=bound, dtype=jnp.float32)

    out = gcn_net_forward(node_features, adjacency, weight, bias)
    out = jax.block_until_ready(out)

    ref = _reference(node_features, adjacency, weight, bias)
    assert out.shape == (B, N, output_dim)
    assert jnp.allclose(out, ref, atol=1e-4, rtol=1e-4), float(jnp.max(jnp.abs(out - ref)))

    print("KERNEL_OK")
</pallas_src>

<mosaic_0001>
module attributes {stable_mosaic.version = 11 : i64} {
  func.func @_gcn_kernel(%arg0: i32, %arg1: memref<2x8x8xf32, #tpu.memory_space<vmem>>, %arg2: memref<2x8x32xf32, #tpu.memory_space<vmem>>, %arg3: memref<32x128xf32, #tpu.memory_space<vmem>>, %arg4: memref<1x128xf32, #tpu.memory_space<vmem>>, %arg5: memref<2x8x128xf32, #tpu.memory_space<vmem>>) attributes {dimension_semantics = [#tpu.dimension_semantics<parallel>], iteration_bounds = array<i64: 1>, scalar_prefetch = 0 : i64, scratch_operands = 0 : i64, tpu.core_type = #tpu.core_type<tc>, window_params = [{transform_indices = @transform_0, window_bounds = array<i64: 2, 8, 8>}, {transform_indices = @transform_1, window_bounds = array<i64: 2, 8, 32>}, {pipeline_mode = #tpu.pipeline_mode<synchronous>, transform_indices = @transform_2, window_bounds = array<i64: 32, 128>}, {pipeline_mode = #tpu.pipeline_mode<synchronous>, transform_indices = @transform_3, window_bounds = array<i64: 1, 128>}, {transform_indices = @transform_4, window_bounds = array<i64: 2, 8, 128>}]} {
    %c0 = arith.constant 0 : index
    %c0_0 = arith.constant 0 : index
    %c0_1 = arith.constant 0 : index
    %0 = vector.load %arg1[%c0, %c0_0, %c0_1] : memref<2x8x8xf32, #tpu.memory_space<vmem>>, vector<2x8x8xf32>
    %c0_2 = arith.constant 0 : index
    %c0_3 = arith.constant 0 : index
    %c0_4 = arith.constant 0 : index
    %1 = vector.load %arg2[%c0_2, %c0_3, %c0_4] : memref<2x8x32xf32, #tpu.memory_space<vmem>>, vector<2x8x32xf32>
    %cst = arith.constant dense<0.000000e+00> : vector<2x8x32xf32>
    %2 = tpu.matmul %0, %1, %cst {dimension_numbers = #tpu.dot_dimension_numbers<[2], [1], [1], [2], [0, 0, 0, 1, 1, 2], [0], [0]>} : vector<2x8x8xf32>, vector<2x8x32xf32>, vector<2x8x32xf32> -> vector<2x8x32xf32>
    %3 = vector.shape_cast %2 : vector<2x8x32xf32> to vector<16x32xf32>
    %c0_5 = arith.constant 0 : index
    %c0_6 = arith.constant 0 : index
    %4 = vector.load %arg3[%c0_5, %c0_6] : memref<32x128xf32, #tpu.memory_space<vmem>>, vector<32x128xf32>
    %cst_7 = arith.constant dense<0.000000e+00> : vector<16x128xf32>
    %5 = tpu.matmul %3, %4, %cst_7 {dimension_numbers = #tpu.dot_dimension_numbers<[1], [0], [0], [1], [0, 0, 1, 1], [], []>} : vector<16x32xf32>, vector<32x128xf32>, vector<16x128xf32> -> vector<16x128xf32>
    %c0_8 = arith.constant 0 : index
    %c0_9 = arith.constant 0 : index
    %6 = vector.load %arg4[%c0_8, %c0_9] : memref<1x128xf32, #tpu.memory_space<vmem>>, vector<1x128xf32>
    %7 = vector.broadcast %6 : vector<1x128xf32> to vector<16x128xf32>
    %8 = arith.addf %5, %7 : vector<16x128xf32>
    %9 = vector.shape_cast %8 : vector<16x128xf32> to vector<2x8x128xf32>
    %c0_10 = arith.constant 0 : index
    %c0_11 = arith.constant 0 : index
    %c0_12 = arith.constant 0 : index
    %10 = vector.load %arg5[%c0_10, %c0_11, %c0_12] : memref<2x8x128xf32, #tpu.memory_space<vmem>>, vector<2x8x128xf32>
    tpu.vector_store %arg5[%c0_10, %c0_11, %c0_12], %9 {strides = array<i32>} : memref<2x8x128xf32, #tpu.memory_space<vmem>>, vector<2x8x128xf32>,
    return
  }
  func.func @transform_0(%arg0: i32) -> (i32, i32, i32) {
    %c0_i32 = arith.constant 0 : i32
    %c0_i32_0 = arith.constant 0 : i32
    %c0_i32_1 = arith.constant 0 : i32
    return %arg0, %c0_i32, %c0_i32_0 : i32, i32, i32
  }
  func.func @transform_1(%arg0: i32) -> (i32, i32, i32) {
    %c0_i32 = arith.constant 0 : i32
    %c0_i32_0 = arith.constant 0 : i32
    %c0_i32_1 = arith.constant 0 : i32
    return %arg0, %c0_i32, %c0_i32_0 : i32, i32, i32
  }
  func.func @transform_2(%arg0: i32) -> (i32, i32) {
    %c0_i32 = arith.constant 0 : i32
    %c0_i32_0 = arith.constant 0 : i32
    %c0_i32_1 = arith.constant 0 : i32
    return %c0_i32, %c0_i32_0 : i32, i32
  }
  func.func @transform_3(%arg0: i32) -> (i32, i32) {
    %c0_i32 = arith.constant 0 : i32
    %c0_i32_0 = arith.constant 0 : i32
    %c0_i32_1 = arith.constant 0 : i32
    return %c0_i32, %c0_i32_0 : i32, i32
  }
  func.func @transform_4(%arg0: i32) -> (i32, i32, i32) {
    %c0_i32 = arith.constant 0 : i32
    %c0_i32_0 = arith.constant 0 : i32
    %c0_i32_1 = arith.constant 0 : i32
    return %arg0, %c0_i32, %c0_i32_0 : i32, i32, i32
  }
}

</mosaic_0001>

<bundles_post_ra>
// kernel: tpu_custom_call.1
= control target key start
LH: loop header
LB: loop body
LE: loop exit
PB: predicated region body
PF: predicated region fallthrough
CT: control target
= control target key end

     0   :  { %9 = vsyncpa [#allocation3], 0  ;;  %s351_s0 = inlined_call_operand.hbm [shape: f32[2,8,8], index: 0, kind: input, shape index: {}]   ;;  %s352_s1 = inlined_call_operand.hbm [shape: f32[2,8,32], index: 1, kind: input, shape index: {}]   ;;  %s353_s2 = inlined_call_operand.hbm [shape: f32[32,128], index: 2, kind: input, shape index: {}]   ;;  %s354_s3 = inlined_call_operand.vmem [shape: f32[1,128], index: 3, kind: input, shape index: {}]   ;;  %s355_s4 = inlined_call_operand.hbm [shape: f32[2,8,128], index: 4, kind: output, shape index: {}]  }
   0x1   :  { %10 = vsyncpa [#allocation6], 0 }
   0x2   :  { %11 = vsyncpa [#allocation4], 0  ;;  %s29_s17 = sshll.u32 %s352_s1, 4  ;;  %s293_s18 = smov [#allocation5]   ;;  %s30_s17 = int_to_ptr.hbm [resolvable:$true] %s29_s17 }
   0x3   :  { %s31_s19 = sshll.u32 %s293_s18, 4  ;;  %s16_s22 = sshll.u32 %s351_s0, 4  ;;  %s32_s19 = int_to_ptr.vmem [resolvable:$true] %s31_s19  ;;  %s17_s22 = int_to_ptr.hbm [resolvable:$true] %s16_s22 }
   0x4   :  { %s294_s23 = smov 128   ;;  %s295_s24 = smov 8  }
   0x5   :  { %37 = dma.hbm_to_vmem [thread:$0]  %s30_s17, 256, %s32_s19, [#allocation6], %s294_s23, %s294_s23, %s295_s24  }
   0x6   :  { %s296_s25 = smov [#allocation2]   ;;  %s42_s1 = sshll.u32 %s353_s2, 4  ;;  %s43_s1 = int_to_ptr.hbm [resolvable:$true] %s42_s1 }
   0x7   :  { %s18_s26 = sshll.u32 %s296_s25, 4  ;;  %s297_s0 = smov [#allocation7]   ;;  %s19_s26 = int_to_ptr.vmem [resolvable:$true] %s18_s26 }
   0x8   :  { %24 = dma.hbm_to_vmem [thread:$0]  %s17_s22, 256, %s19_s26, [#allocation3], %s294_s23, %s294_s23, %s295_s24  }
   0x9   :  { %s44_s29 = sshll.u32 %s297_s0, 4  ;;  %s45_s29 = int_to_ptr.vmem [resolvable:$true] %s44_s29 }
   0xa   :  { %50 = dma.hbm_to_vmem [thread:$0]  %s43_s1, 512, %s45_s29, [#allocation6], %s294_s23, %s294_s23, %s295_s24  }
   0xb   :  { %287 = dma.done.wait [#allocation3], 256  }
   0xc   :  { %288 = vsyncadd [#allocation3], 4294967040 }
   0xd   :  { %289 = dma.done.wait [#allocation6], 768  }
   0xe   :  { %290 = vsyncadd [#allocation6], 4294966528  ;;  %vm69_vm0 = vcmask 64512   ;;  %v67_v0 = vld [vmem:[#allocation5] sm:$0xff]  ;;  %v68_v1 = vld [vmem:[#allocation5 + $0x8] sm:$0xff]  ;;  %vm124_vm1 = vcmask 261120  }
   0xf   :  { %v65_v2 = vld [vmem:[#allocation2] sm:$0xff]  ;;  %88 = vmatpush.msra.mxu0 %v67_v0  ;;  %111 = vmatpush.msra.mxu1 %v68_v1  ;;  %v66_v3 = vld [vmem:[#allocation2 + $0x8] sm:$0xff]  ;;  %v119_v4 = vld [vmem:[#allocation7 + $0x18] sm:$0xff]  ;;  %s298_s5 = smov [#allocation8]   ;;  %s162_s9 = sshll.u32 %s355_s4, 4  ;;  %s163_s9 = int_to_ptr.hbm [resolvable:$true] %s162_s9 }
  0x10   :  { %176 = vmatmul.msk.f32.vlgmr.msra.gmra.mxu0 %vm69_vm0, %v65_v2  ;;  %177 = vmatmul.msk.f32.vlgmr.msra.gmra.mxu1 %vm69_vm0, %v66_v3  ;;  %v118_v5 = vld [vmem:[#allocation7 + $0x10] sm:$0xff]  ;;  %v117_v6 = vld [vmem:[#allocation7 + $0x8] sm:$0xff]  ;;  %v116_v7 = vld [vmem:[#allocation7] sm:$0xff]  ;;  %s160_s6 = sshll.u32 %s298_s5, 4  ;;  %s161_s6 = int_to_ptr.vmem [resolvable:$true] %s160_s6 }
  0x11   :  { %143 = vmatpush.msra.mxu2 %v119_v4  ;;  %180 = vmatpush.msra.mxu3 %v119_v4  ;;  %v190_v10 = vld [vmem:[%s354_s3] ss:$0 sm:$0xff] }
  0x13   :  { %144 = vmatpush.msra.mxu2 %v118_v5  ;;  %181 = vmatpush.msra.mxu3 %v118_v5 }
  0x15   :  { %145 = vmatpush.msra.mxu2 %v117_v6  ;;  %182 = vmatpush.msra.mxu3 %v117_v6 }
  0x17   :  { %146 = vmatpush.msra.mxu2 %v116_v7  ;;  %183 = vmatpush.msra.mxu3 %v116_v7 }
  0x8d   :  { %v90_v8 = vpop.f32.mrf.mxu0  ;;  %v113_v9 = vpop.f32.mrf.mxu1 }
  0x8e   :  { %178 = vmatmul.msk.f32.vlgmr.msra.gmra.mxu2 %vm124_vm1, %v90_v8  ;;  %179 = vmatmul.msk.f32.vlgmr.msra.gmra.mxu3 %vm124_vm1, %v113_v9 }
 0x111   :  { %v148_v11 = vpop.f32.mrf.mxu2  ;;  %v151_v12 = vpop.f32.mrf.mxu3 }
 0x112   :  { %v149_v13 = vadd.f32 %v190_v10, %v148_v11  ;;  %v152_v14 = vadd.f32 %v190_v10, %v151_v12 }
 0x114   :  { %154 = vst [vmem:[#allocation8] sm:$0xff] %v149_v13 }
 0x115   :  { %155 = vst [vmem:[#allocation8 + $0x8] sm:$0xff] %v152_v14 }
 0x116   :  { %168 = dma.vmem_to_hbm [thread:$0]  %s161_s6, 256, %s163_s9, [#allocation4], %s294_s23, %s294_s23, %s295_s24  }
 0x117   :  { %291 = dma.done.wait [#allocation4], 256  }
 0x118   :  { %292 = vsyncadd [#allocation4], 4294967040 }
 0x119   :  { %173 = vsyncpa [#allocation3], 1 }
 0x11a   :  { %174 = vsyncpa [#allocation6], 1 }
 0x11b   :  { %175 = vsyncpa [#allocation4], 1 }

</bundles_post_ra>
